<compile_context>
chip_gen: v6e
topology: v6e:2x2x1
jax: 0.10.0
libtpu: 0.0.40
codegen_flags: <defaults>
</compile_context>

<pallas_src>
import jax
import jax.numpy as jnp
from jax.experimental import pallas as pl
from jax.experimental.pallas import tpu as pltpu


# ----------------------------- VMEM budgeting --------------------------------

_VMEM_CAP_BYTES = None


def _vmem_capacity_bytes():
    """Physical VMEM per TensorCore (128 MiB v5e/v6e, 64 MiB v7x)."""
    global _VMEM_CAP_BYTES
    if _VMEM_CAP_BYTES is None:
        cap = 0
        try:
            cap = int(pltpu.get_tpu_info().vmem_capacity_bytes)
        except Exception:
            cap = 0
        _VMEM_CAP_BYTES = cap if cap > 0 else 64 * 1024 * 1024  # conservative
    return _VMEM_CAP_BYTES


def _vmem_limit_bytes():
    # 96 MiB on 128-MiB parts (v5e/v6e), 48 MiB on 64-MiB parts (v7x).
    return min(3 * _vmem_capacity_bytes() // 4, 96 * 1024 * 1024)


def _block_budget_bytes():
    # Live block-data budget for tile sizing (~half the scoped limit, leaving
    # headroom for Mosaic internal scratch): 48 MiB on v5e/v6e, 24 MiB on v7x.
    return min(3 * _vmem_capacity_bytes() // 8, 48 * 1024 * 1024)


def _sublane(itemsize):
    return max(8, 32 // itemsize)           # 8 rows for f32, 16 for bf16


def _bytes_per_row(hw, itemsize):
    # 2x double-buffered input block + 2x double-buffered output block
    # + ~3 f32 row-temporaries (x_f32, exp, normalized) materialized in VMEM.
    return 4 * hw * itemsize + 12 * hw + 64


def _pick_tile_rows(num_rows, hw, itemsize):
    """Row tile: as big as the budget allows, but >=2 grid steps when possible."""
    sub = _sublane(itemsize)
    tile = max(sub, _block_budget_bytes() // _bytes_per_row(hw, itemsize))
    if num_rows > sub:
        # Keep at least two grid steps so both v7x TensorCores get work.
        half = ((num_rows + 1) // 2 + sub - 1) // sub * sub
        tile = min(tile, half)
    tile = min(tile, num_rows)
    if tile < num_rows:
        tile = max(sub, (tile // sub) * sub)
    return tile


def _pick_fallback_tiles(num_rows, hw, itemsize):
    sub = _sublane(itemsize)
    budget = _block_budget_bytes()
    tr = min(num_rows, 256)
    if tr < num_rows:
        tr = max(sub, (tr // sub) * sub)
    per_elem = 4 * itemsize + 12             # same accounting as _bytes_per_row
    thw = budget // max(tr * per_elem, 1)
    thw = max(128, (thw // 128) * 128)
    thw = min(thw, hw)
    return tr, thw


def _compiler_params(*sem):
    return pltpu.CompilerParams(dimension_semantics=sem,
                                vmem_limit_bytes=_vmem_limit_bytes())


# ------------------------------- main kernels ---------------------------------


def _softmax_rows_kernel(x_ref, o_ref):
    """Row-wise softmax over the last (lane) dim of a (TILE, HW) block."""
    x = x_ref[...].astype(jnp.float32)
    m = jnp.max(x, axis=-1, keepdims=True)
    e = jnp.exp(x - m)
    inv = pl.reciprocal(jnp.sum(e, axis=-1, keepdims=True), approx=False)
    o_ref[...] = (e * inv).astype(o_ref.dtype)


def _softmax_rows_extra_kernel(x_ref, extra_ref, o_ref, o_extra_ref):
    """Row softmax with one extra per-row logit taken from a resident column.

    Rows whose extra logit is -inf degenerate to a plain softmax (exp(-inf)=0).
    """
    tile = x_ref.shape[0]
    row0 = pl.multiple_of(pl.program_id(0) * tile, 8)
    x = x_ref[...].astype(jnp.float32)                         # (TILE, HW)
    ex = extra_ref[pl.ds(row0, tile), :].astype(jnp.float32)   # (TILE, 1)
    m = jnp.maximum(jnp.max(x, axis=-1, keepdims=True), ex)
    e = jnp.exp(x - m)
    e_o = jnp.exp(ex - m)
    inv = pl.reciprocal(jnp.sum(e, axis=-1, keepdims=True) + e_o, approx=False)
    o_ref[...] = (e * inv).astype(o_ref.dtype)
    o_extra_ref[...] = (e_o * inv).astype(o_extra_ref.dtype)


# --------------------------- pallas_call wrappers -----------------------------


def _rowwise_softmax(x_flat):
    r, hw = x_flat.shape
    itemsize = jnp.dtype(x_flat.dtype).itemsize
    tile = _pick_tile_rows(r, hw, itemsize)
    spec = pl.BlockSpec((tile, hw), lambda i: (i, 0))
    cost = pl.CostEstimate(flops=6 * r * hw, transcendentals=r * hw,
                           bytes_accessed=2 * r * hw * itemsize)
    return pl.pallas_call(
        _softmax_rows_kernel,
        out_shape=jax.ShapeDtypeStruct((r, hw), x_flat.dtype),
        grid=(pl.cdiv(r, tile),),
        in_specs=[spec],
        out_specs=spec,
        compiler_params=_compiler_params("parallel"),
        cost_estimate=cost,
    )(x_flat)


def _rowwise_softmax_extra(x_flat, extra_col):
    r, hw = x_flat.shape
    itemsize = jnp.dtype(x_flat.dtype).itemsize
    tile = _pick_tile_rows(r, hw, itemsize)
    num_tiles = -(-r // tile)
    r_pad = num_tiles * tile
    extra_col = extra_col.astype(jnp.float32)
    if r_pad > r:                                  # keep in-kernel pl.ds in bounds
        extra_col = jnp.pad(extra_col, ((0, r_pad - r), (0, 0)),
                            constant_values=-jnp.inf)

    spec = pl.BlockSpec((tile, hw), lambda i: (i, 0))
    extra_spec = pl.BlockSpec((r_pad, 1), lambda i: (0, 0))    # resident in VMEM
    col_out_spec = pl.BlockSpec((tile, 1), lambda i: (i, 0))
    cost = pl.CostEstimate(flops=6 * r * hw, transcendentals=r * (hw + 1),
                           bytes_accessed=2 * r * hw * itemsize + 8 * r)
    return pl.pallas_call(
        _softmax_rows_extra_kernel,
        out_shape=(jax.ShapeDtypeStruct((r, hw), x_flat.dtype),
                   jax.ShapeDtypeStruct((r, 1), jnp.float32)),
        grid=(num_tiles,),
        in_specs=[spec, extra_spec],
        out_specs=(spec, col_out_spec),
        compiler_params=_compiler_params("parallel"),
        cost_estimate=cost,
    )(x_flat, extra_col)


# ----------------------- large-HW lane-blocked fallback -----------------------


def _lane_blocked_softmax(x_flat, extra_col, tr=None, thw=None):
    """Two-pass (online LSE, then normalize) row softmax with HW blocked.

    Used when a minimum row tile at full HW does not fit the VMEM budget.
    `extra_col` is an (R, 1) float32 extra logit per row (-inf rows reduce to a
    plain softmax).  Returns (probs (R, HW), lse (R, 1) float32).
    """
    r, hw = x_flat.shape
    itemsize = jnp.dtype(x_flat.dtype).itemsize
    tr0, thw0 = _pick_fallback_tiles(r, hw, itemsize)
    tr = tr0 if tr is None else tr
    thw = thw0 if thw is None else thw
    n_i = -(-r // tr)
    n_k = -(-hw // thw)
    extra_col = extra_col.astype(jnp.float32)

    def stats_kernel(x_ref, ex_ref, lse_ref, m_sc, l_sc):
        k = pl.program_id(1)

        @pl.when(k == 0)
        def _():
            m_sc[...] = jnp.full_like(m_sc, -jnp.inf)
            l_sc[...] = jnp.zeros_like(l_sc)

        x = x_ref[...].astype(jnp.float32)
        col = k * thw + jax.lax.broadcasted_iota(jnp.int32, x.shape, 1)
        x = jnp.where(col < hw, x, -jnp.inf)        # mask padded lanes (last block)
        m_new = jnp.maximum(m_sc[...], jnp.max(x, axis=-1, keepdims=True))
        l_sc[...] = (l_sc[...] * jnp.exp(m_sc[...] - m_new)
                     + jnp.sum(jnp.exp(x - m_new), axis=-1, keepdims=True))
        m_sc[...] = m_new

        @pl.when(k == pl.num_programs(1) - 1)
        def _():
            ex = ex_ref[...].astype(jnp.float32)    # -inf rows contribute 0
            m_f = jnp.maximum(m_sc[...], ex)
            l_f = l_sc[...] * jnp.exp(m_sc[...] - m_f) + jnp.exp(ex - m_f)
            lse_ref[...] = m_f + jnp.log(l_f)

    lse = pl.pallas_call(
        stats_kernel,
        out_shape=jax.ShapeDtypeStruct((r, 1), jnp.float32),
        grid=(n_i, n_k),
        in_specs=[pl.BlockSpec((tr, thw), lambda i, k: (i, k)),
                  pl.BlockSpec((tr, 1), lambda i, k: (i, 0))],
        out_specs=pl.BlockSpec((tr, 1), lambda i, k: (i, 0)),
        scratch_shapes=[pltpu.VMEM((tr, 1), jnp.float32),
                        pltpu.VMEM((tr, 1), jnp.float32)],
        compiler_params=_compiler_params("parallel", "arbitrary"),
    )(x_flat, extra_col)

    def norm_kernel(x_ref, lse_ref, o_ref):
        x = x_ref[...].astype(jnp.float32)
        o_ref[...] = jnp.exp(x - lse_ref[...]).astype(o_ref.dtype)

    probs = pl.pallas_call(
        norm_kernel,
        out_shape=jax.ShapeDtypeStruct((r, hw), x_flat.dtype),
        grid=(n_i, n_k),
        in_specs=[pl.BlockSpec((tr, thw), lambda i, k: (i, k)),
                  pl.BlockSpec((tr, 1), lambda i, k: (i, 0))],
        out_specs=pl.BlockSpec((tr, thw), lambda i, k: (i, k)),
        compiler_params=_compiler_params("parallel", "parallel"),
    )(x_flat, lse)
    return probs, lse


# ------------------------------- public API -----------------------------------


@jax.jit
def visitation_softmax(visitation_distributions, goal_outside_score=None):
    """JAX/Pallas equivalent of VisitationSoftmax.forward (log=False only).

    visitation_distributions: (N, 2, H, W) float array.
    goal_outside_score: optional (N,) float array.
    Returns:
      if goal_outside_score is None: (N, 2, H, W) probabilities.
      else: ((N, 2, H, W) probabilities, (N,) goal-outside probability).
    """
    n, c, h, w = visitation_distributions.shape
    assert c == 2, ("Must have 2 channels: visitation distribution scores and "
                    "goal distribution scores")
    hw = h * w
    r = 2 * n
    dtype = visitation_distributions.dtype
    itemsize = jnp.dtype(dtype).itemsize

    # Free contiguous view: rows are [n0c0, n0c1, n1c0, n1c1, ...].
    x_flat = visitation_distributions.reshape(r, hw)

    # Large-HW fallback decision (static at trace time).
    lane_blocked = (min(r, _sublane(itemsize)) * _bytes_per_row(hw, itemsize)
                    > _block_budget_bytes())

    if goal_outside_score is None:
        if lane_blocked:
            extra = jnp.full((r, 1), -jnp.inf, jnp.float32)
            probs, _ = _lane_blocked_softmax(x_flat, extra)
        else:
            probs = _rowwise_softmax(x_flat)
        return probs.reshape(n, 2, h, w)

    # Per-row extra logit: -inf for visitation rows, outside score for goal rows.
    neg_inf = jnp.full((n, 1), -jnp.inf, dtype=jnp.float32)
    outside = goal_outside_score.astype(jnp.float32).reshape(n, 1)
    extra_col = jnp.concatenate([neg_inf, outside], axis=1).reshape(r, 1)

    if lane_blocked:
        probs, lse = _lane_blocked_softmax(x_flat, extra_col)
        goal_outside_prob = jnp.exp(outside[:, 0] - lse.reshape(n, 2)[:, 1])
    else:
        probs, extra_p = _rowwise_softmax_extra(x_flat, extra_col)
        goal_outside_prob = extra_p.reshape(n, 2)[:, 1]
    return probs.reshape(n, 2, h, w), goal_outside_prob.astype(dtype)


# ------------------------------- reference ------------------------------------


def _reference(visitation_distributions, goal_outside_score=None):
    """Pure-JAX reference mirroring the PyTorch semantics."""
    n, c, h, w = visitation_distributions.shape
    hw = h * w
    v = visitation_distributions[:, 0].reshape(n, hw)
    g = visitation_distributions[:, 1].reshape(n, hw)
    visit_p = jax.nn.softmax(v, axis=1).reshape(n, h, w)
    if goal_outside_score is None:
        goal_p = jax.nn.softmax(g, axis=1).reshape(n, h, w)
        return jnp.stack([visit_p, goal_p], axis=1)
    full = jnp.concatenate([g, goal_outside_score[:, None]], axis=1)
    full_p = jax.nn.softmax(full, axis=1)
    goal_in = full_p[:, :-1].reshape(n, h, w)
    goal_out = full_p[:, -1]
    return jnp.stack([visit_p, goal_in], axis=1), goal_out


if __name__ == "__main__":
    key = jax.random.PRNGKey(0)
    k1, k2, k3, k4 = jax.random.split(key, 4)

    # ---- Cases 1/2: canonical small shape, single-tile main path ------------
    N, C, H, W = 2, 2, 16, 16
    x = jax.random.normal(k1, (N, C, H, W), dtype=jnp.float32)
    outside = jax.random.normal(k2, (N,), dtype=jnp.float32)

    out1 = jax.block_until_ready(visitation_softmax(x))
    ref1 = _reference(x)
    assert out1.shape == (N, 2, H, W)
    assert jnp.allclose(out1, ref1, atol=1e-6, rtol=1e-6)
    assert jnp.allclose(out1.reshape(N, 2, -1).sum(-1), 1.0, atol=1e-5)

    out2, goal_out_p = visitation_softmax(x, outside)
    out2 = jax.block_until_ready(out2)
    goal_out_p = jax.block_until_ready(goal_out_p)
    ref2, ref2_out = _reference(x, outside)
    assert out2.shape == (N, 2, H, W) and goal_out_p.shape == (N,)
    assert jnp.allclose(out2, ref2, atol=1e-6, rtol=1e-6)
    assert jnp.allclose(goal_out_p, ref2_out, atol=1e-6, rtol=1e-6)
    assert jnp.allclose(out2[:, 0].reshape(N, -1).sum(-1), 1.0, atol=1e-5)
    assert jnp.allclose(out2[:, 1].reshape(N, -1).sum(-1) + goal_out_p, 1.0,
                        atol=1e-5)

    # ---- Case 3: multi-row-tile main path (partial last tile, padded resident
    #      extra column, >=2 grid steps) --------------------------------------
    N3 = 12
    x3 = jax.random.normal(k3, (N3, C, H, W), dtype=jnp.float32)
    outside3 = jax.random.normal(k4, (N3,), dtype=jnp.float32)
    out3 = jax.block_until_ready(visitation_softmax(x3))
    assert jnp.allclose(out3, _reference(x3), atol=1e-6, rtol=1e-6)
    out3b, goal3 = visitation_softmax(x3, outside3)
    out3b = jax.block_until_ready(out3b)
    ref3b, ref3b_out = _reference(x3, outside3)
    assert jnp.allclose(out3b, ref3b, atol=1e-6, rtol=1e-6)
    assert jnp.allclose(goal3, ref3b_out, atol=1e-6, rtol=1e-6)

    # ---- Case 4: lane-blocked two-pass fallback (forced small HW tile so the
    #      online-softmax accumulation and lane masking are exercised) --------
    N4, H4, W4 = 2, 40, 60                      # HW = 2400, not a 512 multiple
    k5, k6 = jax.random.split(k4)
    x4 = jax.random.normal(k5, (N4, C, H4, W4), dtype=jnp.float32)
    outside4 = jax.random.normal(k6, (N4,), dtype=jnp.float32)
    extra4 = jnp.concatenate(
        [jnp.full((N4, 1), -jnp.inf, jnp.float32), outside4.reshape(N4, 1)],
        axis=1).reshape(2 * N4, 1)
    probs4, lse4 = _lane_blocked_softmax(x4.reshape(2 * N4, H4 * W4), extra4,
                                         thw=512)
    probs4 = jax.block_until_ready(probs4)
    ref4, ref4_out = _reference(x4, outside4)
    assert jnp.allclose(probs4.reshape(N4, 2, H4, W4), ref4, atol=1e-5, rtol=1e-5)
    out4_p = jnp.exp(outside4 - lse4.reshape(N4, 2)[:, 1])
    assert jnp.allclose(out4_p, ref4_out, atol=1e-5, rtol=1e-5)

    # ---- Case 5: bf16 I/O (compute stays f32 in-kernel) ----------------------
    x_bf = x.astype(jnp.bfloat16)
    out_bf = jax.block_until_ready(visitation_softmax(x_bf))
    ref_bf = _reference(x_bf.astype(jnp.float32))
    assert jnp.allclose(out_bf.astype(jnp.float32), ref_bf, atol=2e-2)

    print("KERNEL_OK")
</pallas_src>

<mosaic_0001>
module attributes {stable_mosaic.version = 11 : i64} {
  func.func @_softmax_rows_kernel(%arg0: i32, %arg1: memref<4x256xf32, #tpu.memory_space<vmem>>, %arg2: memref<4x256xf32, #tpu.memory_space<vmem>>) attributes {dimension_semantics = [#tpu.dimension_semantics<parallel>], iteration_bounds = array<i64: 1>, scalar_prefetch = 0 : i64, scratch_operands = 0 : i64, tpu.core_type = #tpu.core_type<tc>, window_params = [{transform_indices = @transform_0, window_bounds = array<i64: 4, 256>}, {transform_indices = @transform_1, window_bounds = array<i64: 4, 256>}]} {
    %c0 = arith.constant 0 : index
    %c0_0 = arith.constant 0 : index
    %0 = vector.load %arg1[%c0, %c0_0] : memref<4x256xf32, #tpu.memory_space<vmem>>, vector<4x256xf32>
    %cst = arith.constant dense<0xFF800000> : vector<4xf32>
    %1 = vector.multi_reduction <maximumf>, %0, %cst [1] : vector<4x256xf32> to vector<4xf32>
    %2 = vector.shape_cast %1 : vector<4xf32> to vector<4x1xf32>
    %3 = vector.broadcast %2 : vector<4x1xf32> to vector<4x256xf32>
    %4 = arith.subf %0, %3 : vector<4x256xf32>
    %5 = math.exp %4 : vector<4x256xf32>
    %cst_1 = arith.constant dense<0.000000e+00> : vector<4xf32>
    %6 = vector.multi_reduction <add>, %5, %cst_1 [1] : vector<4x256xf32> to vector<4xf32>
    %7 = vector.shape_cast %6 : vector<4xf32> to vector<4x1xf32>
    %8 = tpu.reciprocal %7 : vector<4x1xf32> -> vector<4x1xf32>
    %9 = vector.broadcast %8 : vector<4x1xf32> to vector<4x256xf32>
    %10 = arith.mulf %5, %9 : vector<4x256xf32>
    %c0_2 = arith.constant 0 : index
    %c0_3 = arith.constant 0 : index
    %11 = vector.load %arg2[%c0_2, %c0_3] : memref<4x256xf32, #tpu.memory_space<vmem>>, vector<4x256xf32>
    tpu.vector_store %arg2[%c0_2, %c0_3], %10 {strides = array<i32>} : memref<4x256xf32, #tpu.memory_space<vmem>>, vector<4x256xf32>,
    return
  }
  func.func @transform_0(%arg0: i32) -> (i32, i32) {
    %c0_i32 = arith.constant 0 : i32
    %c0_i32_0 = arith.constant 0 : i32
    return %arg0, %c0_i32 : i32, i32
  }
  func.func @transform_1(%arg0: i32) -> (i32, i32) {
    %c0_i32 = arith.constant 0 : i32
    %c0_i32_0 = arith.constant 0 : i32
    return %arg0, %c0_i32 : i32, i32
  }
}

</mosaic_0001>

<bundles_post_ra>
// kernel: visitation_softmax.1
= control target key start
LH: loop header
LB: loop body
LE: loop exit
PB: predicated region body
PF: predicated region fallthrough
CT: control target
= control target key end

     0   :  { %vm12_vm0 = vcmask 1043456   ;;  %v60_v5 = vmov 839922192   ;;  %v22_v7 = vlaneseq  ;;  %s81_s0 = inlined_call_operand.vmem [shape: f32[4,256], index: 0, kind: input, shape index: {}]   ;;  %s82_s1 = inlined_call_operand.vmem [shape: f32[4,256], index: 1, kind: output, shape index: {}]  }
   0x1   :  { %v8_v0 = vld [vmem:[%s81_s0] sm:$0xff]  ;;  %v20_v6 = vunpack.c.l.s4 %v60_v5 }
   0x2   :  { %v10_v1 = vcombine.high %v8_v0, %v8_v0  ;;  %v13_v2 = vsel %vm12_vm0, %v8_v0, -inf  ;;  %v23_v9 = vshrl.u32 %v22_v7, 7 }
   0x3   :  { %v21_v8 = vunpack.c.0.s8 %v20_v6 }
   0x4   :  { %v14_v3 = vsel %vm12_vm0, %v10_v1, -inf }
   0x5   :  { %v15_v4 = vmax.f32 %v13_v2, %v14_v3  ;;  %v24_v10 = vsub.s32 %v21_v8, %v23_v9 }
   0x7   :  { %16 = vmax.xlane.f32.xlu0 %v15_v4 }
  0x90   :  { %v17_v11 = vpop.xlane.xlu0 %16 }
  0x91   :  { %v25_v12 = vrot.slane %v17_v11, %v24_v10 }
  0x93   :  { %v27_v13 = vsub.f32 %v8_v0, %v25_v12 }
  0x95   :  { %v28_v14 = vmul.f32 1.442695, %v27_v13 }
  0x97   :  { %56 = vpow2.f32 %v28_v14 }
  0xa4   :  { %v57_v15 = vpop.eup %56 }
  0xa5   :  { %v31_v16 = vcombine.high %v57_v15, %v57_v15  ;;  %v33_v17 = vsel %vm12_vm0, %v57_v15, 0.0 }
  0xa7   :  { %v34_v18 = vsel %vm12_vm0, %v31_v16, 0.0 }
  0xa8   :  { %v35_v19 = vadd.f32 %v34_v18, %v33_v17 }
  0xaa   :  { %36 = vadd.xlane.f32.xlu0 %v35_v19 }
 0x133   :  { %v37_v20 = vpop.xlane.xlu0 %36 }
 0x134   :  { %58 = vrcp.f32 %v37_v20 }
 0x141   :  { %v59_v21 = vpop.eup %58 }
 0x142   :  { %v46_v22 = vrot.slane %v59_v21, %v24_v10 }
 0x144   :  { %v48_v23 = vmul.f32 %v57_v15, %v46_v22 }
 0x146   :  { %49 = vst [vmem:[%s82_s1] sm:$0xff] %v48_v23 }

</bundles_post_ra>
